<compile_context>
chip_gen: v7x
topology: tpu7x:2x2x1
jax: 0.10.0
libtpu: 0.0.40
codegen_flags: <defaults>
</compile_context>

<pallas_src>
import functools
import math

import jax
import jax.numpy as jnp
from jax.experimental import pallas as pl
from jax.experimental.pallas import tpu as pltpu


def _cheb_clenshaw_kernel(z_ref, gso_ref, b_ref, o_ref, *, Ks):
    """out = sum_k T_k(gso) @ z_k  (+ bias), lane-dense over TB slabs.

    z_ref  : [Ks, N, TB*c_out]  z_k = x_slab @ W_k, lanes ordered (slab, c_out)
    gso_ref: [N, N]
    b_ref  : [1, TB*c_out]      bias tiled per slab (f32)
    o_ref  : [N, TB*c_out]
    """
    if Ks == 1:
        acc = z_ref[0]
    else:
        gso = gso_ref[...]
        if Ks == 2:
            acc = z_ref[0] + jnp.dot(gso, z_ref[1],
                                     preferred_element_type=jnp.float32)
        else:
            g2 = gso + gso          # 2*gso, once, on the small [N,N] tile
            b2 = z_ref[Ks - 1]
            b1 = z_ref[Ks - 2] + jnp.dot(g2, b2,
                                         preferred_element_type=jnp.float32)
            for k in range(Ks - 3, 0, -1):          # static -> unrolled
                b_new = (z_ref[k]
                         + jnp.dot(g2, b1, preferred_element_type=jnp.float32)
                         - b2)
                b2 = b1
                b1 = b_new
            acc = (z_ref[0]
                   + jnp.dot(gso, b1, preferred_element_type=jnp.float32)
                   - b2)
    acc = acc + b_ref[...]                          # broadcast over node rows
    o_ref[...] = acc.astype(o_ref.dtype)


def _choose_tb(bt, c_out, *, target_cols=512, min_blocks=4):
    """TB with TB*c_out a multiple of 128 and ~target_cols lanes, capped so the
    1-D grid keeps >= min_blocks steps (pipeline overlap; 2 steps/TC on v7x)."""
    g = math.gcd(c_out, 128)
    tb_min = 128 // g
    tb = tb_min
    while tb * c_out < target_cols:
        tb += tb_min
    max_tb = max(tb_min, (bt // min_blocks) // tb_min * tb_min)
    return max(tb_min, min(tb, max_tb))


def cheb_graph_conv(x, gso, weight, bias, *, tb=None, target_cols=512):
    """Pallas ChebGraphConv forward.

    x      : [B, T, N, c_in]
    gso    : [N, N]
    weight : [Ks, c_in, c_out]
    bias   : [c_out] or None
    returns: [B, T, N, c_out]
    """
    B, T, N, c_in = x.shape
    Ks, c_in_w, c_out = weight.shape
    if Ks < 1:
        raise ValueError(f"Ks must be a positive integer, got {Ks}")
    assert c_in_w == c_in, "weight/input channel mismatch"

    BT = B * T
    if tb is None:
        tb = _choose_tb(BT, c_out, target_cols=target_cols)
    bt_pad = pl.cdiv(BT, tb) * tb
    n_blocks = bt_pad // tb
    cols = tb * c_out

    xf = x.reshape(BT, N, c_in)
    if bt_pad != BT:
        xf = jnp.pad(xf, ((0, bt_pad - BT), (0, 0), (0, 0)))

    # Fused weight projection + lane packing: one dense matmul (contraction
    # depth c_in only), output already in the (k-major, node-sublane,
    # (slab, c_out)-lane) layout the kernel consumes.
    z = jnp.einsum('sni,kij->knsj', xf, weight).reshape(Ks, N, bt_pad * c_out)

    # Bias tiled per slab, kept in f32 (single rounding at the final store).
    if bias is None:
        bias_t = jnp.zeros((1, cols), dtype=jnp.float32)
    else:
        bias_t = jnp.tile(bias.astype(jnp.float32).reshape(1, c_out), (1, tb))

    # VMEM budget: double-buffered z/out blocks, single-buffered gso/bias,
    # plus in-kernel temporaries (b1, b2, acc, one dot result, 2*gso) in f32.
    zt = jnp.dtype(z.dtype).itemsize
    ot = jnp.dtype(x.dtype).itemsize
    gt = jnp.dtype(gso.dtype).itemsize
    est = (2 * Ks * N * cols * zt            # z blocks (double-buffered)
           + 2 * N * cols * ot               # out blocks (double-buffered)
           + N * N * gt + cols * 4           # gso, bias (Buffered(1))
           + 4 * N * cols * 4 + N * N * 4)   # f32 temporaries
    vmem_limit = int(min(48 << 20, max(32 << 20, 2 * est)))

    kernel = functools.partial(_cheb_clenshaw_kernel, Ks=Ks)

    out_packed = pl.pallas_call(
        kernel,
        out_shape=jax.ShapeDtypeStruct((N, bt_pad * c_out), x.dtype),
        grid_spec=pltpu.PrefetchScalarGridSpec(
            num_scalar_prefetch=0,
            grid=(n_blocks,),
            in_specs=[
                pl.BlockSpec((Ks, N, cols), lambda i: (0, 0, i)),
                pl.BlockSpec((N, N), lambda i: (0, 0),
                             pipeline_mode=pl.Buffered(1)),
                pl.BlockSpec((1, cols), lambda i: (0, 0),
                             pipeline_mode=pl.Buffered(1)),
            ],
            out_specs=pl.BlockSpec((N, cols), lambda i: (0, i)),
        ),
        compiler_params=pltpu.CompilerParams(
            dimension_semantics=("parallel",),
            vmem_limit_bytes=vmem_limit),
    )(z, gso, bias_t)

    # Unpack lane-dense output -> native [B, T, N, c_out].
    # TODO(synk): if c_out >= 128, store the native layout directly from the
    #             kernel (pltpu.einshape on the idle XLU) and drop this pass.
    out = jnp.transpose(out_packed.reshape(N, bt_pad, c_out), (1, 0, 2))
    return out[:BT].reshape(B, T, N, c_out)


def cheb_graph_conv_ref(x, gso, weight, bias):
    """Pure-JAX reference mirroring the PyTorch forward."""
    Ks = weight.shape[0]
    x_list = [x]
    if Ks >= 2:
        x_list.append(jnp.einsum('hi,btij->bthj', gso, x))
        for k in range(2, Ks):
            x_list.append(jnp.einsum('hi,btij->bthj', 2.0 * gso, x_list[k - 1])
                          - x_list[k - 2])
    xs = jnp.stack(x_list, axis=2)                      # [B, T, Ks, N, c_in]
    out = jnp.einsum('btkhi,kij->bthj', xs, weight)     # [B, T, N, c_out]
    if bias is not None:
        out = out + bias
    return out


if __name__ == "__main__":
    # Small shapes implied by the module's forward: x [B, T, N, c_in].
    # B*T = 128 with TB=32 -> 4 grid blocks (>= 2 per TensorCore on v7x).
    B, T, N, c_in, c_out, Ks = 2, 64, 16, 4, 8, 3

    key = jax.random.PRNGKey(0)
    kx, kg, kw, kb = jax.random.split(key, 4)

    x = jax.random.normal(kx, (B, T, N, c_in), dtype=jnp.float32)

    # Symmetric, roughly normalized graph shift operator.
    g = jax.random.normal(kg, (N, N), dtype=jnp.float32)
    gso = (g + g.T) / (2.0 * math.sqrt(N))

    # Deterministic kaiming-uniform-like init (a=sqrt(5)) for weight,
    # uniform(-1/sqrt(fan_in), 1/sqrt(fan_in)) for bias (fan_in = c_in*c_out,
    # matching torch's fan calculation on a [Ks, c_in, c_out] tensor).
    fan_in = c_in * c_out
    gain = math.sqrt(2.0 / (1.0 + 5.0))
    w_bound = gain * math.sqrt(3.0 / fan_in)
    weight = jax.random.uniform(kw, (Ks, c_in, c_out), dtype=jnp.float32,
                                minval=-w_bound, maxval=w_bound)
    b_bound = 1.0 / math.sqrt(fan_in)
    bias = jax.random.uniform(kb, (c_out,), dtype=jnp.float32,
                              minval=-b_bound, maxval=b_bound)

    out = cheb_graph_conv(x, gso, weight, bias)
    out = jax.block_until_ready(out)

    ref = cheb_graph_conv_ref(x, gso, weight, bias)
    assert out.shape == (B, T, N, c_out)
    assert jnp.allclose(out, ref, atol=1e-4, rtol=1e-4), "mismatch vs reference"

    print("KERNEL_OK")
</pallas_src>

<mosaic_0001>
module attributes {stable_mosaic.version = 11 : i64} {
  func.func @_cheb_clenshaw_kernel(%arg0: i32, %arg1: memref<3x16x256xf32, #tpu.memory_space<vmem>>, %arg2: memref<16x16xf32, #tpu.memory_space<vmem>>, %arg3: memref<1x256xf32, #tpu.memory_space<vmem>>, %arg4: memref<16x256xf32, #tpu.memory_space<vmem>>) attributes {dimension_semantics = [#tpu.dimension_semantics<parallel>], iteration_bounds = array<i64: 4>, scalar_prefetch = 0 : i64, scratch_operands = 0 : i64, tpu.core_type = #tpu.core_type<tc>, window_params = [{transform_indices = @transform_0, window_bounds = array<i64: 3, 16, 256>}, {pipeline_mode = #tpu.pipeline_mode<synchronous>, transform_indices = @transform_1, window_bounds = array<i64: 16, 16>}, {pipeline_mode = #tpu.pipeline_mode<synchronous>, transform_indices = @transform_2, window_bounds = array<i64: 1, 256>}, {transform_indices = @transform_3, window_bounds = array<i64: 16, 256>}]} {
    %c0 = arith.constant 0 : index
    %c0_0 = arith.constant 0 : index
    %0 = vector.load %arg2[%c0, %c0_0] : memref<16x16xf32, #tpu.memory_space<vmem>>, vector<16x16xf32>
    %1 = arith.addf %0, %0 : vector<16x16xf32>
    %c2 = arith.constant 2 : index
    %c0_1 = arith.constant 0 : index
    %c0_2 = arith.constant 0 : index
    %2 = vector.load %arg1[%c2, %c0_1, %c0_2] : memref<3x16x256xf32, #tpu.memory_space<vmem>>, vector<1x16x256xf32>
    %3 = vector.shape_cast %2 : vector<1x16x256xf32> to vector<16x256xf32>
    %c1 = arith.constant 1 : index
    %c0_3 = arith.constant 0 : index
    %c0_4 = arith.constant 0 : index
    %4 = vector.load %arg1[%c1, %c0_3, %c0_4] : memref<3x16x256xf32, #tpu.memory_space<vmem>>, vector<1x16x256xf32>
    %5 = vector.shape_cast %4 : vector<1x16x256xf32> to vector<16x256xf32>
    %cst = arith.constant dense<0.000000e+00> : vector<16x256xf32>
    %6 = tpu.matmul %1, %3, %cst {dimension_numbers = #tpu.dot_dimension_numbers<[1], [0], [0], [1], [0, 0, 1, 1], [], []>} : vector<16x16xf32>, vector<16x256xf32>, vector<16x256xf32> -> vector<16x256xf32>
    %7 = arith.addf %5, %6 : vector<16x256xf32>
    %c0_5 = arith.constant 0 : index
    %c0_6 = arith.constant 0 : index
    %c0_7 = arith.constant 0 : index
    %8 = vector.load %arg1[%c0_5, %c0_6, %c0_7] : memref<3x16x256xf32, #tpu.memory_space<vmem>>, vector<1x16x256xf32>
    %9 = vector.shape_cast %8 : vector<1x16x256xf32> to vector<16x256xf32>
    %cst_8 = arith.constant dense<0.000000e+00> : vector<16x256xf32>
    %10 = tpu.matmul %0, %7, %cst_8 {dimension_numbers = #tpu.dot_dimension_numbers<[1], [0], [0], [1], [0, 0, 1, 1], [], []>} : vector<16x16xf32>, vector<16x256xf32>, vector<16x256xf32> -> vector<16x256xf32>
    %11 = arith.addf %9, %10 : vector<16x256xf32>
    %12 = arith.subf %11, %3 : vector<16x256xf32>
    %c0_9 = arith.constant 0 : index
    %c0_10 = arith.constant 0 : index
    %13 = vector.load %arg3[%c0_9, %c0_10] : memref<1x256xf32, #tpu.memory_space<vmem>>, vector<1x256xf32>
    %14 = vector.broadcast %13 : vector<1x256xf32> to vector<16x256xf32>
    %15 = arith.addf %12, %14 : vector<16x256xf32>
    %c0_11 = arith.constant 0 : index
    %c0_12 = arith.constant 0 : index
    %16 = vector.load %arg4[%c0_11, %c0_12] : memref<16x256xf32, #tpu.memory_space<vmem>>, vector<16x256xf32>
    tpu.vector_store %arg4[%c0_11, %c0_12], %15 {strides = array<i32>} : memref<16x256xf32, #tpu.memory_space<vmem>>, vector<16x256xf32>,
    return
  }
  func.func @transform_0(%arg0: i32) -> (i32, i32, i32) {
    %c0_i32 = arith.constant 0 : i32
    %c0_i32_0 = arith.constant 0 : i32
    %c0_i32_1 = arith.constant 0 : i32
    return %c0_i32, %c0_i32_0, %arg0 : i32, i32, i32
  }
  func.func @transform_1(%arg0: i32) -> (i32, i32) {
    %c0_i32 = arith.constant 0 : i32
    %c0_i32_0 = arith.constant 0 : i32
    %c0_i32_1 = arith.constant 0 : i32
    return %c0_i32, %c0_i32_0 : i32, i32
  }
  func.func @transform_2(%arg0: i32) -> (i32, i32) {
    %c0_i32 = arith.constant 0 : i32
    %c0_i32_0 = arith.constant 0 : i32
    %c0_i32_1 = arith.constant 0 : i32
    return %c0_i32, %c0_i32_0 : i32, i32
  }
  func.func @transform_3(%arg0: i32) -> (i32, i32) {
    %c0_i32 = arith.constant 0 : i32
    %c0_i32_0 = arith.constant 0 : i32
    return %c0_i32, %arg0 : i32, i32
  }
}

</mosaic_0001>

<bundles_post_ra>
// kernel: tpu_custom_call.1
= control target key start
LH: loop header
LB: loop body
LE: loop exit
PB: predicated region body
PF: predicated region fallthrough
CT: control target
= control target key end

     0   :  { %8 = vsyncpa [#allocation3], 0  ;;  %s1014_s0 = inlined_call_operand.hbm [shape: f32[3,16,1024], index: 0, kind: input, shape index: {}]   ;;  %s1015_s1 = inlined_call_operand.hbm [shape: f32[16,16], index: 1, kind: input, shape index: {}]   ;;  %s1016_s2 = inlined_call_operand.vmem [shape: f32[1,256], index: 2, kind: input, shape index: {}]   ;;  %s1017_s3 = inlined_call_operand.hbm [shape: f32[16,1024], index: 3, kind: output, shape index: {}]  }
   0x1   :  { %10 = vsyncpa [#allocation3 + $0x1], 0 }
   0x2   :  { %11 = vsyncpa [#allocation6], 0 }
   0x3   :  { %12 = vsyncpa [#allocation4], 0 }
   0x4   :  { %14 = vsyncpa [#allocation4 + $0x1], 0  ;;  %s786_s12 = smov 0   ;;  %s788_s13 = smov 0  }
   0x5   :  { %s790_s14 = smov 0   ;;  %s792_s15 = smov 0  }
   0x6 LB: > { %s807_s16 = sadd.s32 4294967295, %s752_s15   ;;  %s520_s17 = sadd.s32 4294967294, %s752_s15   ;;  %s752_s15 = sphi %s792_s15, %s1040_s15   ;;  %s748_s14 = sphi %s790_s14, %s1039_s14   ;;  %s744_s13 = sphi %s788_s13, %s1038_s13   ;;  %s740_s12 = sphi %s786_s12, %s1037_s12  }
   0x7   : > { %s811_s18 = sadd.s32 1, %s752_s15   ;;  %s27_s19 = sadd.s32 1, %s748_s14 }
   0x8   : > { %s24_s20 = ssub.s32 %s752_s15, %s811_s18  ;;  %p34_p0 = scmp.ne.s32.totalorder %s748_s14, %s744_s13 }
   0x9   : > { %p25_p1 = scmp.eq.s32.totalorder %s24_s20, 0  ;;  %p35_p2 = scmp.eq.s32.totalorder %s752_s15, 0 }
   0xa   : > { %p40_p3 = scmp.ne.s32.totalorder %s744_s13, %s740_s12  ;;  %p1018_p4 = scmp.eq.s32.totalorder %s807_s16, 0 }
   0xb   : > { %s823_s21 = scalar_select %p25_p1, %s748_s14, %s27_s19  }
   0xc   : > { %p825_p5 = por %p35_p2, %p34_p0  ;;  %p831_p6 = por %p1018_p4, %p40_p3 }
   0xd   : > { %p106_p7 = scmp.eq.s32.totalorder %s807_s16, 3  ;;  %p112_p8 = scmp.eq.s32.totalorder %s520_s17, 3 }
   0xe   : > { %s1022_s22 = scalar_select %p825_p5, 1, 0 }
   0xf   : > { %s1023_s23 = scalar_select %p831_p6, 1, 0 }
  0x10   : > { %p521_p9 = scmp.ge.s32.totalorder %s752_s15, 1  ;;  %p119_p10 = scmp.lt.s32.totalorder %s752_s15, 5 }
  0x11   : > { %p838_p11 = por %p106_p7, %p34_p0  ;;  %p842_p12 = por %p112_p8, %p40_p3 }
  0x12   : > { %p846_p13 = pnand %p521_p9, %p119_p10  ;;  %s754_s27 = smov [#allocation5]  }
  0x13   : > { %s1024_s24 = scalar_select %p838_p11, 1, 0 }
  0x14   : > { %s1025_s25 = scalar_select %p842_p12, 1, 0 }
  0x15   : > { %s1026_s26 = scalar_select %p846_p13, 1, 0 }
  0x16   : > { %p566_p1 = pneg %p846_p13  ;;  %s131_s28 = sshll.u32 %s754_s27, 4  ;;  %s132_s28 = int_to_ptr.vmem [resolvable:$true] %s131_s28 }
  0x17   : > { %s148_s30 = sand.u32 1, %s748_s14   ;;  %s624_s6 = scalar_lea.hbm %s1015_s1, 256 }
  0x18   : > { %p854_p2 = pnand %p566_p1, %p1018_p4  ;;  %p625_p3 = scmp.ne.s32.totalorder %s1015_s1, %s624_s6 }
  0x19   : > { %p631_p10 = scmp.lt.u32.totalorder %s624_s6, %s1015_s1 }
  0x1a   : > { %p626_p7 = pneg %p854_p2 }
  0x1c   : > { %p627_p8 = pnand %p626_p7, %p625_p3 }
  0x1e   : > { %p628_p9 = pneg %p627_p8 }
  0x20   : > { %p633_p1 = pnand %p631_p10, %p628_p9 }
  0x22   : > { %636 = shalt.err (!%p633_p1)
}
  0x23   : > { %s637_s11 = scalar_lea.vmem %s132_s28, 256  ;;  %p645_p11 = scmp.lt.s32.totalorder %s132_s28, %s132_s28 }
  0x24   : > { %p638_p4 = scmp.ne.s32.totalorder %s132_s28, %s637_s11  ;;  %p646_p6 = scmp.lt.s32.totalorder %s637_s11, %s637_s11 }
  0x26   : > { %p640_p0 = pnand %p638_p4, %p626_p7  ;;  %p647_p13 = por %p646_p6, %p645_p11 }
  0x28   : > { %p641_p12 = pneg %p640_p0 }
  0x2a   : > { %p648_p5 = pnand %p647_p13, %p641_p12 }
  0x2c   : > { %651 = shalt.err (!%p648_p5)
}
  0x2d   : > { %s755_s17 = smov 128   ;;  %s756_s19 = smov 8  }
  0x2e   : > { %569 = dma.hbm_to_vmem [thread:$0]  (!%p854_p2), %s1015_s1, 256, %s132_s28, [#allocation6], %s755_s17, %s755_s17, %s756_s19  }
  0x2f   : > { %p1028_p3 = scmp.ne.s32.totalorder %s1022_s22, 0  ;;  %p1029_p8 = scmp.lt.s32.totalorder %s752_s15, 4 }
  0x30   : > { %s556_s5 = smul.u32 96, %s148_s30  ;;  %s546_s6 = sshll.u32 %s752_s15, 8 }
  0x31   : > { %p880_p4 = pnand %p1029_p8, %p1028_p3  ;;  %s888_s9 = scalar_lea.hbm %s1014_s0, %s546_s6 }
  0x32   : > { %s152_s28 = scalar_lea.vmem [#allocation2], %s556_s5  ;;  %s892_s29 = scalar_lea.sflag [#allocation3], %s148_s30 }
  0x33   : > { %s159_s22 = sshll.u32 %s152_s28, 4  ;;  %s652_s10 = scalar_lea.hbm %s888_s9, 1536  ;;  %s890_s22 = int_to_ptr.vmem [resolvable:$true] %s159_s22 }
  0x34   : > { %p653_p5 = scmp.ne.s32.totalorder %s888_s9, %s652_s10  ;;  %p654_p6 = pneg %p880_p4 }
  0x35   : > { %s657_s19 = scalar_lea.hbm %s1014_s0, 6144  ;;  %p658_p13 = scmp.lt.u32.totalorder %s888_s9, %s1014_s0 }
  0x36   : > { %p655_p11 = pnand %p654_p6, %p653_p5  ;;  %p659_p2 = scmp.lt.u32.totalorder %s657_s19, %s652_s10 }
  0x37   : > { %p661_p7 = scmp.lt.u32.totalorder %s652_s10, %s888_s9 }
  0x38   : > { %p656_p12 = pneg %p655_p11  ;;  %p660_p0 = por %p659_p2, %p658_p13 }
  0x3a   : > { %p662_p9 = por %p661_p7, %p660_p0 }
  0x3c   : > { %p663_p10 = pnand %p662_p9, %p656_p12 }
  0x3e   : > { %666 = shalt.err (!%p663_p10)
}
  0x3f   : > { %s667_s30 = scalar_lea.vmem %s890_s22, 1536  ;;  %s757_s5 = smov [#allocation2]  }
  0x40   : > { %p668_p1 = scmp.ne.s32.totalorder %s890_s22, %s667_s30  ;;  %s672_s6 = sshll.u32 %s757_s5, 4  ;;  %s673_s6 = int_to_ptr.vmem [resolvable:$false] %s672_s6 }
  0x41   : > { %s674_s7 = scalar_lea.vmem %s673_s6, 3072  ;;  %p675_p5 = scmp.lt.s32.totalorder %s890_s22, %s673_s6 }
  0x42   : > { %p670_p3 = pnand %p668_p1, %p654_p6  ;;  %p676_p11 = scmp.lt.s32.totalorder %s674_s7, %s667_s30 }
  0x44   : > { %p671_p8 = pneg %p670_p3  ;;  %p677_p13 = por %p676_p11, %p675_p5 }
  0x46   : > { %p678_p2 = pnand %p677_p13, %p671_p8 }
  0x48   : > { %681 = shalt.err (!%p678_p2)
}
  0x49   : > { %s758_s8 = smov 1024   ;;  %s759_s28 = smov 256  }
  0x4a   : > { %s760_s10 = smov 16   ;;  %p1031_p6 = scmp.ne.s32.totalorder %s1026_s26, 0 }
  0x4b   : > { %573 = dma.hbm_to_vmem [thread:$0]  (!%p880_p4), %s888_s9, 1536, %s890_s22, %s892_s29, %s758_s8, %s759_s28, %s760_s10  }
  0x4c   : > { %171 = sbr.rel (%p1031_p6) target bundleno = 558 (0x22e), region = 32  ;;  %s923_s11 = sand.u32 (!%p1031_p6), 1, %s744_s13  }
  0x4d   : > { %s557_s17 = smul.u32 (!%p1031_p6), 96, %s923_s11  ;;  %s174_s19 = scalar_lea.sflag (!%p1031_p6), [#allocation3], %s923_s11 }
  0x4e   : > { %p1032_p12 = scmp.ne.s32.totalorder (!%p1031_p6), %s1023_s23, 0 }
  0x4f   : > { %s927_s20 = scalar_lea.vmem (!%p1031_p6), [#allocation2], %s557_s17 }
  0x53   : > { %727 = dma.done.wait (%p1032_p12), %s174_s19, 1536  }
  0x54   : > { %729 = vsyncadd (%p1032_p12), %s174_s19, 4294965760  ;;  %p1033_p4 = scmp.eq.s32.totalorder %s807_s16, 0 }
  0x56   : > { %731 = dma.done.wait (%p1033_p4), [#allocation6], 256   ;;  %p1034_p0 = pmov %p1033_p4 }
  0x57   : > { %v761_v0 = vmov 0.0   ;;  %v530_v1 = vld [vmem:[%s927_s20 + $0x48] sm:$0xff]  ;;  %v939_v2 = vld [vmem:[%s927_s20 + $0x58] sm:$0xff]  ;;  %v529_v3 = vld [vmem:[%s927_s20 + $0x40] sm:$0xff]  ;;  %vm220_vm0 = vcmask 130048   ;;  %v405_v25 = vlaneseq  ;;  %s528_s4 = sshll.u32 %s923_s11, 5 }
  0x58   : > { %733 = vsyncadd (%p1034_p0), [#allocation6], 4294967040  ;;  %291 = vmatprep.mubr.f32.mxu0 %v761_v0  ;;  %382 = vmatprep.mubr.f32.mxu1 %v761_v0  ;;  %v548_v4 = vpack.c.bf16 %v939_v2, %v530_v1  ;;  %v944_v5 = vld [vmem:[%s927_s20 + $0x50] sm:$0xff]  ;;  %v206_v6 = vld [vmem:[#allocation5] sm:$0xff]  ;;  %s203_s9 = scalar_lea.vmem [#allocation7], %s528_s4  ;;  %s547_s29 = sshll.u32 %s807_s16, 8 }
  0x59   : > { %v550_v7 = vpack.c.bf16 %v944_v5, %v529_v3  ;;  %v208_v8 = vadd.f32 %v206_v6, %v206_v6  ;;  %v207_v9 = vld [vmem:[#allocation5 + $0x8] sm:$0xff]  ;;  %v533_v13 = vld [vmem:[%s927_s20 + $0x20] sm:$0xff]  ;;  %v535_v14 = vld [vmem:[%s927_s20 + $0x30] sm:$0xff]  ;;  %v406_v26 = vshrl.u32 %v405_v25, 7  ;;  %s437_s22 = sshll.u32 %s203_s9, 4  ;;  %s971_s5 = scalar_lea.hbm %s1017_s3, %s547_s29  ;;  %s965_s22 = int_to_ptr.vmem [resolvable:$true] %s437_s22 }
  0x5a   : > { %549 = vmatprep.subr.bf16.mxu0 %v548_v4  ;;  %v209_v10 = vadd.f32 %v207_v9, %v207_v9  ;;  %v534_v15 = vld [vmem:[%s927_s20 + $0x28] sm:$0xff]  ;;  %v536_v16 = vld [vmem:[%s927_s20 + $0x38] sm:$0xff]  ;;  %v308_v28 = vld [vmem:[%s927_s20] sm:$0xff]  ;;  %s424_s16 = scalar_lea.sflag [#allocation4], %s923_s11  ;;  %s682_s6 = scalar_lea.vmem %s965_s22, 512 }
  0x5b   : > { %551 = vmatpush1.bf16.msra.mxu0 %v550_v7  ;;  %v407_v27 = vsub.s32 0, %v406_v26  ;;  %v403_v29 = vld [vmem:[%s1016_s2] sm:$0x3]  ;;  %v411_v30 = vsub.s32 1, %v406_v26  ;;  %v309_v31 = vld [vmem:[%s927_s20 + $0x8] sm:$0xff]  ;;  %v310_v38 = vld [vmem:[%s927_s20 + $0x10] sm:$0xff]  ;;  %p683_p7 = scmp.ne.s32.totalorder %s965_s22, %s682_s6 }
  0x5c   : > { %v311_v40 = vld [vmem:[%s927_s20 + $0x18] sm:$0xff]  ;;  %p1035_p9 = scmp.ne.s32.totalorder %s1024_s24, 0  ;;  %s762_s7 = smov [#allocation7]  }
  0x5d   : > { %v408_v34 = vrot.slane %v403_v29, %v407_v27  ;;  %v412_v37 = vrot.slane %v403_v29, %v411_v30  ;;  %s686_s8 = sshll.u32 %s762_s7, 4  ;;  %s687_s8 = int_to_ptr.vmem [resolvable:$false] %s686_s8 }
  0x5e   : > { %537 = vmatmul.mubr.msk.f32.vlgmr.msra.gmra.mrb[0].mxu0 %vm220_vm0, %v208_v8  ;;  %p684_p10 = pnand %p683_p7, %p1035_p9  ;;  %s688_s28 = scalar_lea.vmem %s687_s8, 1024 }
  0x5f   : > { %297 = vmatprep.mubr.f32.mxu0 %v761_v0  ;;  %p689_p3 = scmp.lt.s32.totalorder %s965_s22, %s687_s8  ;;  %p690_p8 = scmp.lt.s32.totalorder %s688_s28, %s682_s6 }
  0x60   : > { %p685_p1 = pneg %p684_p10 }
  0x61   : > { %p691_p5 = por %p690_p8, %p689_p3 }
  0x62   : > { %538 = vmatmul.mubr.msk.f32.gmra.mrb[2].mxu0 %vm220_vm0, %v209_v10 }
  0x63   : > { %p692_p11 = pnand %p691_p5, %p685_p1 }
 0x131   : > { %v293_v11 = vpop.f32.mrb[0].mxu0 }
 0x132   : > { %v295_v12 = vpop.f32.mrb[1].mxu0  ;;  %v304_v18 = vadd.f32 %v533_v13, %v293_v11 }
 0x133   : > { %v305_v21 = vadd.f32 %v534_v15, %v295_v12 }
 0x135   : > { %v299_v17 = vpop.f32.mrb[2].mxu0 }
 0x136   : > { %v306_v19 = vadd.f32 %v535_v14, %v299_v17  ;;  %v301_v20 = vpop.f32.mrb[3].mxu0 }
 0x137   : > { %v307_v22 = vadd.f32 %v536_v16, %v301_v20 }
 0x138   : > { %v554_v23 = vpack.c.bf16 %v306_v19, %v304_v18 }
 0x139   : > { %v552_v24 = vpack.c.bf16 %v307_v22, %v305_v21 }
 0x13b   : > { %553 = vmatprep.subr.bf16.mxu1 %v552_v24 }
 0x13c   : > { %555 = vmatpush1.bf16.msra.mxu1 %v554_v23 }
 0x13f   : > { %539 = vmatmul.mubr.msk.f32.vlgmr.msra.gmra.mrb[0].mxu1 %vm220_vm0, %v206_v6 }
 0x140   : > { %388 = vmatprep.mubr.f32.mxu1 %v761_v0 }
 0x143   : > { %540 = vmatmul.mubr.msk.f32.gmra.mrb[2].mxu1 %vm220_vm0, %v207_v9 }
 0x212   : > { %v384_v32 = vpop.f32.mrb[0].mxu1 }
 0x213   : > { %v395_v33 = vadd.f32 %v384_v32, %v308_v28  ;;  %v386_v35 = vpop.f32.mrb[1].mxu1 }
 0x214   : > { %v396_v36 = vadd.f32 %v386_v35, %v309_v31 }
 0x215   : > { %v399_v39 = vsub.f32 %v395_v33, %v529_v3 }
 0x216   : > { %v400_v41 = vsub.f32 %v396_v36, %v530_v1  ;;  %v390_v42 = vpop.f32.mrb[2].mxu1 }
 0x217   : > { %v415_v43 = vadd.f32 %v408_v34, %v399_v39  ;;  %v397_v44 = vadd.f32 %v390_v42, %v310_v38  ;;  %v392_v45 = vpop.f32.mrb[3].mxu1 }
 0x218   : > { %v416_v46 = vadd.f32 %v412_v37, %v400_v41  ;;  %v398_v47 = vadd.f32 %v392_v45, %v311_v40 }
 0x219   : > { %419 = vst [vmem:[%s203_s9] sm:$0xff] %v415_v43  ;;  %v401_v48 = vsub.f32 %v397_v44, %v944_v5 }
 0x21a   : > { %420 = vst [vmem:[%s203_s9 + $0x8] sm:$0xff] %v416_v46  ;;  %v402_v49 = vsub.f32 %v398_v47, %v939_v2 }
 0x21b   : > { %v417_v50 = vadd.f32 %v408_v34, %v401_v48 }
 0x21c   : > { %v418_v51 = vadd.f32 %v412_v37, %v402_v49 }
 0x21d   : > { %421 = vst [vmem:[%s203_s9 + $0x10] sm:$0xff] %v417_v50 }
 0x21e   : > { %422 = vst [vmem:[%s203_s9 + $0x18] sm:$0xff] %v418_v51 }
 0x21f   : > { %695 = shalt.err (!%p692_p11)
}
 0x220   : > { %s696_s10 = scalar_lea.hbm %s971_s5, 512  ;;  %s700_s20 = scalar_lea.hbm %s1017_s3, 2048 }
 0x221   : > { %p697_p13 = scmp.ne.s32.totalorder %s971_s5, %s696_s10  ;;  %p701_p12 = scmp.lt.u32.totalorder %s971_s5, %s1017_s3 }
 0x222   : > { %p702_p4 = scmp.lt.u32.totalorder %s700_s20, %s696_s10  ;;  %p704_p7 = scmp.lt.u32.totalorder %s696_s10, %s971_s5 }
 0x223   : > { %p698_p2 = pnand %p697_p13, %p1035_p9 }
 0x224   : > { %p703_p0 = por %p702_p4, %p701_p12 }
 0x225   : > { %p699_p6 = pneg %p698_p2 }
 0x226   : > { %p705_p10 = por %p704_p7, %p703_p0 }
 0x228   : > { %p706_p1 = pnand %p705_p10, %p699_p6 }
 0x22a   : > { %709 = shalt.err (!%p706_p1)
}
 0x22b   : > { %s763_s4 = smov 256   ;;  %s764_s9 = smov 1024  }
 0x22c   : > { %s765_s29 = smov 16  }
 0x22d   : > { %564 = dma.vmem_to_hbm [thread:$0]  (%p1035_p9), %s965_s22, 512, %s971_s5, %s424_s16, %s763_s4, %s764_s9, %s765_s29  }
 0x22e PF: > { %p581_p3 = scmp.ge.s32.totalorder %s752_s15, 2  ;;  %s452_s27 = sand.u32 1, %s740_s12  }
 0x22f   : > { %p1036_p8 = scmp.ne.s32.totalorder %s1025_s25, 0  ;;  %s453_s30 = scalar_lea.sflag [#allocation4], %s452_s27 }
 0x231   : > { %p575_p5 = pnand %p581_p3, %p1036_p8 }
 0x233   : > { %735 = dma.done.wait (!%p575_p5), %s453_s30, 512  }
 0x234   : > { %737 = vsyncadd (!%p575_p5), %s453_s30, 4294966784  ;;  %p17_p11 = scmp.ge.s32.totalorder %s811_s18, 6   ;;  %s1037_s12 = smov %s744_s13 }
 0x235   : > { %s1038_s13 = smov %s748_s14  ;;  %s1039_s14 = smov %s823_s21 }
 0x236   : > { %s1040_s15 = smov %s811_s18  ;;  %19 = sbr.rel (!%p17_p11) target bundleno = 6 (0x6), region = 83 }
 0x23d   :  { %458 = vsyncpa [#allocation3], 1 }
 0x23e   :  { %460 = vsyncpa [#allocation3 + $0x1], 1 }
 0x23f   :  { %461 = vsyncpa [#allocation6], 1 }
 0x240   :  { %462 = vsyncpa [#allocation4], 1 }
 0x241   :  { %464 = vsyncpa [#allocation4 + $0x1], 1 }

</bundles_post_ra>
